<compile_context>
chip_gen: v6e
topology: v6e:2x2x1
jax: 0.10.0
libtpu: 0.0.40
codegen_flags: <defaults>
</compile_context>

<pallas_src>
import math

import jax
import jax.numpy as jnp
from jax.experimental import pallas as pl
from jax.experimental.pallas import tpu as pltpu


# MXU operand dtype: bf16 inputs + f32 accumulation (set to jnp.float32 for
# bit-closer numerics; bf16 is the right choice on v6e/v7x).
MXU_DTYPE = jnp.bfloat16


def _pick_tile(dim, candidates):
    """Largest candidate tile that evenly divides `dim`, else the full dim.

    Tiles are sized so that (2 operands x 2 double buffers x tile) stays well
    under the default scoped-VMEM limit on all of v5e/v6e/v7x (64 MiB physical
    on v7x is the binding constraint)."""
    for c in candidates:
        if dim >= c and dim % c == 0:
            return c
    return dim  # small / ragged dim -> single full-size block


# ----------------------------- linear kernel -----------------------------
def _linear_kernel(x_ref, w_ref, b_ref, o_ref, acc_ref):
    k = pl.program_id(2)

    @pl.when(k == 0)
    def _():
        acc_ref[...] = jnp.zeros_like(acc_ref)

    acc_ref[...] += jnp.dot(
        x_ref[...].astype(MXU_DTYPE),
        w_ref[...].astype(MXU_DTYPE),
        preferred_element_type=jnp.float32,
    )

    @pl.when(k == pl.num_programs(2) - 1)
    def _():
        o_ref[...] = (acc_ref[...] + b_ref[...]).astype(o_ref.dtype)


def linear(x, w, b):
    """y = x @ w + b, tiled + pipelined.  x:(M,K) w:(K,N) b:(N,)."""
    m, kdim = x.shape
    n = w.shape[1]
    tm = _pick_tile(m, (256, 128))
    tn = _pick_tile(n, (256, 128))
    tk = _pick_tile(kdim, (512, 256))
    grid = (m // tm, n // tn, kdim // tk)
    cost = pl.CostEstimate(
        flops=2 * m * n * kdim,
        transcendentals=0,
        bytes_accessed=4 * (m * kdim + kdim * n + m * n + n),
    )
    return pl.pallas_call(
        _linear_kernel,
        out_shape=jax.ShapeDtypeStruct((m, n), jnp.float32),
        grid_spec=pltpu.PrefetchScalarGridSpec(
            num_scalar_prefetch=0,
            grid=grid,
            in_specs=[
                pl.BlockSpec((tm, tk), lambda i, j, k: (i, k)),
                pl.BlockSpec((tk, tn), lambda i, j, k: (k, j)),
                pl.BlockSpec((1, tn), lambda i, j, k: (0, j)),
            ],
            out_specs=pl.BlockSpec((tm, tn), lambda i, j, k: (i, j)),
            scratch_shapes=[pltpu.VMEM((tm, tn), jnp.float32)],
        ),
        compiler_params=pltpu.CompilerParams(
            dimension_semantics=("parallel", "parallel", "arbitrary"),
        ),
        cost_estimate=cost,
    )(x, w, b.reshape(1, n))


# ------------------ fused attention + output-projection ------------------
def _attn_proj_kernel(q_ref, k_ref, v_ref, m_ref, wp_ref, bp_ref, o_ref):
    # q: (1,H,Sq,D)  k,v: (1,H,Sk,D)  m: (1,1,Sk)  wp: (H,D,N)  bp: (1,N)
    # o: (1,Sq,N) where N = H*D = hidden_size
    q = q_ref[0]          # (H, Sq, D)
    k = k_ref[0]          # (H, Sk, D)
    v = v_ref[0]          # (H, Sk, D)
    mask = m_ref[...]     # (1, 1, Sk); 1.0 = attend, 0.0 = masked

    # 1/sqrt(D) scale is folded into wq/bq upstream.
    # Batched over heads; contracts on the last dim of both operands, so K is
    # consumed by the MXU without a transpose.
    scores = jnp.einsum(
        "hqd,hkd->hqk",
        q.astype(MXU_DTYPE), k.astype(MXU_DTYPE),
        preferred_element_type=jnp.float32,
    )                                                   # (H, Sq, Sk)
    scores = scores + (1.0 - mask) * -10000.0           # additive mask, f32

    # numerically-stable softmax along Sk (matches torch.nn.Softmax(dim=-1));
    # kept in f32 for v5e (no bf16 VPU/EUP).
    scores = scores - jnp.max(scores, axis=-1, keepdims=True)
    probs = jnp.exp(scores)
    probs = probs * pl.reciprocal(
        jnp.sum(probs, axis=-1, keepdims=True), approx=True)

    # attn_drop has p=0.0 -> identity
    ctx = jnp.einsum(
        "hqk,hkd->hqd",
        probs.astype(MXU_DTYPE), v.astype(MXU_DTYPE),
        preferred_element_type=jnp.float32,
    )                                                   # (H, Sq, D)

    # Fused output projection: concat_h(ctx_h) @ Wp + bp
    #   == sum_h ctx_h @ Wp[h*D:(h+1)*D, :] + bp
    # (batched MXU matmul over heads, then a cheap VPU reduction over the
    # major axis) -> no head-merge relayout and a single lane-dense store.
    proj = jnp.einsum(
        "hqd,hdn->hqn",
        ctx.astype(MXU_DTYPE), wp_ref[...].astype(MXU_DTYPE),
        preferred_element_type=jnp.float32,
    )                                                   # (H, Sq, N)
    out = jnp.sum(proj, axis=0) + bp_ref[...]           # (Sq, N), proj_drop p=0.0
    o_ref[0] = out.astype(o_ref.dtype)


def attention_project(q, k, v, mask, wp_heads, bp):
    """q:(B,H,Sq,D) k,v:(B,H,Sk,D) mask:(B,Sk) wp_heads:(H,D,N) bp:(N,)
    -> projected output (B, Sq, N)."""
    B, H, Sq, D = q.shape
    Sk = k.shape[2]
    hidden = H * D
    # TODO(synk): for ragged real-model Sk, pad Sk up to a multiple of 128 and
    # fold the padding into the additive mask for full-vreg softmax tiles.
    cost = pl.CostEstimate(
        flops=2 * B * H * Sq * Sk * D      # scores
        + 2 * B * H * Sq * Sk * D          # context
        + 2 * B * H * Sq * D * hidden,     # fused output projection
        transcendentals=B * H * Sq * Sk,
        bytes_accessed=4 * (B * H * Sq * D + 2 * B * H * Sk * D + B * Sk
                            + H * D * hidden + hidden + B * Sq * hidden),
    )
    return pl.pallas_call(
        _attn_proj_kernel,
        out_shape=jax.ShapeDtypeStruct((B, Sq, hidden), jnp.float32),
        grid=(B,),
        in_specs=[
            pl.BlockSpec((1, H, Sq, D), lambda b: (b, 0, 0, 0)),
            pl.BlockSpec((1, H, Sk, D), lambda b: (b, 0, 0, 0)),
            pl.BlockSpec((1, H, Sk, D), lambda b: (b, 0, 0, 0)),
            pl.BlockSpec((1, 1, Sk), lambda b: (b, 0, 0)),
            # constant index_map -> weight/bias stay resident in VMEM
            pl.BlockSpec((H, D, hidden), lambda b: (0, 0, 0)),
            pl.BlockSpec((1, hidden), lambda b: (0, 0)),
        ],
        out_specs=pl.BlockSpec((1, Sq, hidden), lambda b: (b, 0, 0)),
        compiler_params=pltpu.CompilerParams(
            dimension_semantics=("parallel",),
        ),
        cost_estimate=cost,
    )(q, k, v, mask.reshape(B, 1, Sk), wp_heads, bp.reshape(1, hidden))


# ----------------------------- full module --------------------------------
def cross_attention_forward(params, hidden_states, encoder_hidden_states,
                            encoder_attention_mask, num_heads):
    B, Sq, hidden = hidden_states.shape
    _, Sk, enc_hidden = encoder_hidden_states.shape
    head_dim = hidden // num_heads
    scale = 1.0 / math.sqrt(head_dim)

    # Q projection with 1/sqrt(D) folded into the weights/bias.
    q = linear(hidden_states.reshape(B * Sq, hidden),
               params["wq"] * scale, params["bq"] * scale).reshape(B, Sq, hidden)

    # Fused K+V projection: encoder activations stream from HBM once.
    # (In production the concatenated weight would be built once at init time.)
    wkv = jnp.concatenate([params["wk"], params["wv"]], axis=1)   # (enc, 2*hidden)
    bkv = jnp.concatenate([params["bk"], params["bv"]], axis=0)   # (2*hidden,)
    kv = linear(encoder_hidden_states.reshape(B * Sk, enc_hidden), wkv, bkv)
    k = kv[:, :hidden].reshape(B, Sk, hidden)
    v = kv[:, hidden:].reshape(B, Sk, hidden)

    # transpose_for_scores on the inputs (cheap XLA transposes); the attention
    # kernel applies the fused output projection and writes (B, Sq, hidden)
    # directly -> no post-kernel head-merge or extra linear pass.
    def split_heads(x, S):
        return x.reshape(B, S, num_heads, head_dim).transpose(0, 2, 1, 3)

    # Wp viewed per head-row-block: wp_heads[h, d, n] = wp[h*D + d, n]
    wp_heads = params["wp"].reshape(num_heads, head_dim, hidden)

    out = attention_project(split_heads(q, Sq), split_heads(k, Sk),
                            split_heads(v, Sk), encoder_attention_mask,
                            wp_heads, params["bp"])
    return out


def init_params(key, hidden_size, encoder_hidden_size):
    ks = jax.random.split(key, 8)
    scale_h = 1.0 / math.sqrt(hidden_size)
    scale_e = 1.0 / math.sqrt(encoder_hidden_size)
    return {
        # weights stored (in_features, out_features)
        "wq": jax.random.uniform(ks[0], (hidden_size, hidden_size),
                                 jnp.float32, -scale_h, scale_h),
        "bq": jax.random.uniform(ks[1], (hidden_size,), jnp.float32, -scale_h, scale_h),
        "wk": jax.random.uniform(ks[2], (encoder_hidden_size, hidden_size),
                                 jnp.float32, -scale_e, scale_e),
        "bk": jax.random.uniform(ks[3], (hidden_size,), jnp.float32, -scale_e, scale_e),
        "wv": jax.random.uniform(ks[4], (encoder_hidden_size, hidden_size),
                                 jnp.float32, -scale_e, scale_e),
        "bv": jax.random.uniform(ks[5], (hidden_size,), jnp.float32, -scale_e, scale_e),
        "wp": jax.random.uniform(ks[6], (hidden_size, hidden_size),
                                 jnp.float32, -scale_h, scale_h),
        "bp": jax.random.uniform(ks[7], (hidden_size,), jnp.float32, -scale_h, scale_h),
    }


def reference_forward(params, hs, ehs, mask, num_heads):
    """Pure-JAX f32 reference matching the PyTorch module."""
    B, Sq, hidden = hs.shape
    Sk = ehs.shape[1]
    D = hidden // num_heads
    q = hs @ params["wq"] + params["bq"]
    k = ehs @ params["wk"] + params["bk"]
    v = ehs @ params["wv"] + params["bv"]

    def split(x, S):
        return x.reshape(B, S, num_heads, D).transpose(0, 2, 1, 3)

    qh, kh, vh = split(q, Sq), split(k, Sk), split(v, Sk)
    scores = jnp.einsum("bhqd,bhkd->bhqk", qh, kh) / math.sqrt(D)
    scores = scores + ((1.0 - mask) * -10000.0)[:, None, None, :]
    probs = jax.nn.softmax(scores, axis=-1)
    ctx = jnp.einsum("bhqk,bhkd->bhqd", probs, vh)
    ctx = ctx.transpose(0, 2, 1, 3).reshape(B, Sq, hidden)
    return ctx @ params["wp"] + params["bp"]


if __name__ == "__main__":
    # small, module-consistent shapes
    B = 2
    Sq = 8            # decoder / query sequence length
    Sk = 16           # encoder sequence length
    hidden_size = 32
    encoder_hidden_size = 48
    num_heads = 8     # -> head_dim = 4

    key = jax.random.PRNGKey(0)
    kp, kx, ke, km = jax.random.split(key, 4)

    params = init_params(kp, hidden_size, encoder_hidden_size)
    hidden_states = jax.random.normal(kx, (B, Sq, hidden_size), jnp.float32)
    encoder_hidden_states = jax.random.normal(
        ke, (B, Sk, encoder_hidden_size), jnp.float32)
    # binary attention mask over encoder positions (1 = attend, 0 = masked)
    encoder_attention_mask = (
        jax.random.uniform(km, (B, Sk)) > 0.2).astype(jnp.float32)

    fwd = jax.jit(cross_attention_forward, static_argnums=4)
    out = fwd(params, hidden_states, encoder_hidden_states,
              encoder_attention_mask, num_heads)
    out = jax.block_until_ready(out)

    assert out.shape == (B, Sq, hidden_size)
    assert jnp.all(jnp.isfinite(out))

    # loose tolerance: bf16 MXU operands + approx reciprocal vs f32 reference
    ref = reference_forward(params, hidden_states, encoder_hidden_states,
                            encoder_attention_mask, num_heads)
    assert jnp.allclose(out, ref, atol=5e-2, rtol=5e-2)

    print("KERNEL_OK")
</pallas_src>

<mosaic_0001>
module attributes {stable_mosaic.version = 11 : i64} {
  func.func @_linear_kernel(%arg0: i32, %arg1: i32, %arg2: i32, %arg3: memref<16x32xf32, #tpu.memory_space<vmem>>, %arg4: memref<32x32xf32, #tpu.memory_space<vmem>>, %arg5: memref<1x32xf32, #tpu.memory_space<vmem>>, %arg6: memref<16x32xf32, #tpu.memory_space<vmem>>, %arg7: memref<16x32xf32, #tpu.memory_space<vmem>>) attributes {dimension_semantics = [#tpu.dimension_semantics<parallel>, #tpu.dimension_semantics<parallel>, #tpu.dimension_semantics<arbitrary>], iteration_bounds = array<i64: 1, 1, 1>, scalar_prefetch = 0 : i64, scratch_operands = 1 : i64, tpu.core_type = #tpu.core_type<tc>, window_params = [{transform_indices = @transform_0, window_bounds = array<i64: 16, 32>}, {transform_indices = @transform_1, window_bounds = array<i64: 32, 32>}, {transform_indices = @transform_2, window_bounds = array<i64: 1, 32>}, {transform_indices = @transform_3, window_bounds = array<i64: 16, 32>}]} {
    %c0_i32 = arith.constant 0 : i32
    %0 = arith.cmpi eq, %arg2, %c0_i32 : i32
    %1 = arith.extui %0 : i1 to i32
    %c0_i32_0 = arith.constant 0 : i32
    %2 = arith.cmpi ne, %1, %c0_i32_0 : i32
    scf.if %2 {
      %cst_10 = arith.constant 0.000000e+00 : f32
      %14 = vector.broadcast %cst_10 : f32 to vector<16x32xf32>
      %c0_11 = arith.constant 0 : index
      %c0_12 = arith.constant 0 : index
      %15 = vector.load %arg7[%c0_11, %c0_12] : memref<16x32xf32, #tpu.memory_space<vmem>>, vector<16x32xf32>
      tpu.vector_store %arg7[%c0_11, %c0_12], %14 {strides = array<i32>} : memref<16x32xf32, #tpu.memory_space<vmem>>, vector<16x32xf32>,
    } else {
    }
    %c0 = arith.constant 0 : index
    %c0_1 = arith.constant 0 : index
    %3 = vector.load %arg7[%c0, %c0_1] : memref<16x32xf32, #tpu.memory_space<vmem>>, vector<16x32xf32>
    %c0_2 = arith.constant 0 : index
    %c0_3 = arith.constant 0 : index
    %4 = vector.load %arg3[%c0_2, %c0_3] : memref<16x32xf32, #tpu.memory_space<vmem>>, vector<16x32xf32>
    %5 = arith.truncf %4 : vector<16x32xf32> to vector<16x32xbf16>
    %c0_4 = arith.constant 0 : index
    %c0_5 = arith.constant 0 : index
    %6 = vector.load %arg4[%c0_4, %c0_5] : memref<32x32xf32, #tpu.memory_space<vmem>>, vector<32x32xf32>
    %7 = arith.truncf %6 : vector<32x32xf32> to vector<32x32xbf16>
    %cst = arith.constant dense<0.000000e+00> : vector<16x32xf32>
    %8 = tpu.matmul %5, %7, %cst {dimension_numbers = #tpu.dot_dimension_numbers<[1], [0], [0], [1], [0, 0, 1, 1], [], []>} : vector<16x32xbf16>, vector<32x32xbf16>, vector<16x32xf32> -> vector<16x32xf32>
    %9 = arith.addf %3, %8 : vector<16x32xf32>
    %c0_6 = arith.constant 0 : index
    %c0_7 = arith.constant 0 : index
    %10 = vector.load %arg7[%c0_6, %c0_7] : memref<16x32xf32, #tpu.memory_space<vmem>>, vector<16x32xf32>
    tpu.vector_store %arg7[%c0_6, %c0_7], %9 {strides = array<i32>} : memref<16x32xf32, #tpu.memory_space<vmem>>, vector<16x32xf32>,
    %c0_i32_8 = arith.constant 0 : i32
    %11 = arith.cmpi eq, %arg2, %c0_i32_8 : i32
    %12 = arith.extui %11 : i1 to i32
    %c0_i32_9 = arith.constant 0 : i32
    %13 = arith.cmpi ne, %12, %c0_i32_9 : i32
    scf.if %13 {
      %c0_10 = arith.constant 0 : index
      %c0_11 = arith.constant 0 : index
      %14 = vector.load %arg7[%c0_10, %c0_11] : memref<16x32xf32, #tpu.memory_space<vmem>>, vector<16x32xf32>
      %c0_12 = arith.constant 0 : index
      %c0_13 = arith.constant 0 : index
      %15 = vector.load %arg5[%c0_12, %c0_13] : memref<1x32xf32, #tpu.memory_space<vmem>>, vector<1x32xf32>
      %16 = vector.broadcast %15 : vector<1x32xf32> to vector<16x32xf32>
      %17 = arith.addf %14, %16 : vector<16x32xf32>
      %c0_14 = arith.constant 0 : index
      %c0_15 = arith.constant 0 : index
      %18 = vector.load %arg6[%c0_14, %c0_15] : memref<16x32xf32, #tpu.memory_space<vmem>>, vector<16x32xf32>
      tpu.vector_store %arg6[%c0_14, %c0_15], %17 {strides = array<i32>} : memref<16x32xf32, #tpu.memory_space<vmem>>, vector<16x32xf32>,
    } else {
    }
    return
  }
  func.func @transform_0(%arg0: i32, %arg1: i32, %arg2: i32) -> (i32, i32) {
    %c0_i32 = arith.constant 0 : i32
    return %arg0, %arg2 : i32, i32
  }
  func.func @transform_1(%arg0: i32, %arg1: i32, %arg2: i32) -> (i32, i32) {
    %c0_i32 = arith.constant 0 : i32
    return %arg2, %arg1 : i32, i32
  }
  func.func @transform_2(%arg0: i32, %arg1: i32, %arg2: i32) -> (i32, i32) {
    %c0_i32 = arith.constant 0 : i32
    %c0_i32_0 = arith.constant 0 : i32
    return %c0_i32, %arg1 : i32, i32
  }
  func.func @transform_3(%arg0: i32, %arg1: i32, %arg2: i32) -> (i32, i32) {
    %c0_i32 = arith.constant 0 : i32
    return %arg0, %arg1 : i32, i32
  }
}

module attributes {stable_mosaic.version = 11 : i64} {
  func.func @_linear_kernel(%arg0: i32, %arg1: i32, %arg2: i32, %arg3: memref<32x48xf32, #tpu.memory_space<vmem>>, %arg4: memref<48x64xf32, #tpu.memory_space<vmem>>, %arg5: memref<1x64xf32, #tpu.memory_space<vmem>>, %arg6: memref<32x64xf32, #tpu.memory_space<vmem>>, %arg7: memref<32x64xf32, #tpu.memory_space<vmem>>) attributes {dimension_semantics = [#tpu.dimension_semantics<parallel>, #tpu.dimension_semantics<parallel>, #tpu.dimension_semantics<arbitrary>], iteration_bounds = array<i64: 1, 1, 1>, scalar_prefetch = 0 : i64, scratch_operands = 1 : i64, tpu.core_type = #tpu.core_type<tc>, window_params = [{transform_indices = @transform_0, window_bounds = array<i64: 32, 48>}, {transform_indices = @transform_1, window_bounds = array<i64: 48, 64>}, {transform_indices = @transform_2, window_bounds = array<i64: 1, 64>}, {transform_indices = @transform_3, window_bounds = array<i64: 32, 64>}]} {
    %c0_i32 = arith.constant 0 : i32
    %0 = arith.cmpi eq, %arg2, %c0_i32 : i32
    %1 = arith.extui %0 : i1 to i32
    %c0_i32_0 = arith.constant 0 : i32
    %2 = arith.cmpi ne, %1, %c0_i32_0 : i32
    scf.if %2 {
      %cst_10 = arith.constant 0.000000e+00 : f32
      %14 = vector.broadcast %cst_10 : f32 to vector<32x64xf32>
      %c0_11 = arith.constant 0 : index
      %c0_12 = arith.constant 0 : index
      %15 = vector.load %arg7[%c0_11, %c0_12] : memref<32x64xf32, #tpu.memory_space<vmem>>, vector<32x64xf32>
      tpu.vector_store %arg7[%c0_11, %c0_12], %14 {strides = array<i32>} : memref<32x64xf32, #tpu.memory_space<vmem>>, vector<32x64xf32>,
    } else {
    }
    %c0 = arith.constant 0 : index
    %c0_1 = arith.constant 0 : index
    %3 = vector.load %arg7[%c0, %c0_1] : memref<32x64xf32, #tpu.memory_space<vmem>>, vector<32x64xf32>
    %c0_2 = arith.constant 0 : index
    %c0_3 = arith.constant 0 : index
    %4 = vector.load %arg3[%c0_2, %c0_3] : memref<32x48xf32, #tpu.memory_space<vmem>>, vector<32x48xf32>
    %5 = arith.truncf %4 : vector<32x48xf32> to vector<32x48xbf16>
    %c0_4 = arith.constant 0 : index
    %c0_5 = arith.constant 0 : index
    %6 = vector.load %arg4[%c0_4, %c0_5] : memref<48x64xf32, #tpu.memory_space<vmem>>, vector<48x64xf32>
    %7 = arith.truncf %6 : vector<48x64xf32> to vector<48x64xbf16>
    %cst = arith.constant dense<0.000000e+00> : vector<32x64xf32>
    %8 = tpu.matmul %5, %7, %cst {dimension_numbers = #tpu.dot_dimension_numbers<[1], [0], [0], [1], [0, 0, 1, 1], [], []>} : vector<32x48xbf16>, vector<48x64xbf16>, vector<32x64xf32> -> vector<32x64xf32>
    %9 = arith.addf %3, %8 : vector<32x64xf32>
    %c0_6 = arith.constant 0 : index
    %c0_7 = arith.constant 0 : index
    %10 = vector.load %arg7[%c0_6, %c0_7] : memref<32x64xf32, #tpu.memory_space<vmem>>, vector<32x64xf32>
    tpu.vector_store %arg7[%c0_6, %c0_7], %9 {strides = array<i32>} : memref<32x64xf32, #tpu.memory_space<vmem>>, vector<32x64xf32>,
    %c0_i32_8 = arith.constant 0 : i32
    %11 = arith.cmpi eq, %arg2, %c0_i32_8 : i32
    %12 = arith.extui %11 : i1 to i32
    %c0_i32_9 = arith.constant 0 : i32
    %13 = arith.cmpi ne, %12, %c0_i32_9 : i32
    scf.if %13 {
      %c0_10 = arith.constant 0 : index
      %c0_11 = arith.constant 0 : index
      %14 = vector.load %arg7[%c0_10, %c0_11] : memref<32x64xf32, #tpu.memory_space<vmem>>, vector<32x64xf32>
      %c0_12 = arith.constant 0 : index
      %c0_13 = arith.constant 0 : index
      %15 = vector.load %arg5[%c0_12, %c0_13] : memref<1x64xf32, #tpu.memory_space<vmem>>, vector<1x64xf32>
      %16 = vector.broadcast %15 : vector<1x64xf32> to vector<32x64xf32>
      %17 = arith.addf %14, %16 : vector<32x64xf32>
      %c0_14 = arith.constant 0 : index
      %c0_15 = arith.constant 0 : index
      %18 = vector.load %arg6[%c0_14, %c0_15] : memref<32x64xf32, #tpu.memory_space<vmem>>, vector<32x64xf32>
      tpu.vector_store %arg6[%c0_14, %c0_15], %17 {strides = array<i32>} : memref<32x64xf32, #tpu.memory_space<vmem>>, vector<32x64xf32>,
    } else {
    }
    return
  }
  func.func @transform_0(%arg0: i32, %arg1: i32, %arg2: i32) -> (i32, i32) {
    %c0_i32 = arith.constant 0 : i32
    return %arg0, %arg2 : i32, i32
  }
  func.func @transform_1(%arg0: i32, %arg1: i32, %arg2: i32) -> (i32, i32) {
    %c0_i32 = arith.constant 0 : i32
    return %arg2, %arg1 : i32, i32
  }
  func.func @transform_2(%arg0: i32, %arg1: i32, %arg2: i32) -> (i32, i32) {
    %c0_i32 = arith.constant 0 : i32
    %c0_i32_0 = arith.constant 0 : i32
    return %c0_i32, %arg1 : i32, i32
  }
  func.func @transform_3(%arg0: i32, %arg1: i32, %arg2: i32) -> (i32, i32) {
    %c0_i32 = arith.constant 0 : i32
    return %arg0, %arg1 : i32, i32
  }
}

module attributes {stable_mosaic.version = 11 : i64} {
  func.func @_attn_proj_kernel(%arg0: i32, %arg1: memref<1x8x8x4xf32, #tpu.memory_space<vmem>>, %arg2: memref<1x8x16x4xf32, #tpu.memory_space<vmem>>, %arg3: memref<1x8x16x4xf32, #tpu.memory_space<vmem>>, %arg4: memref<1x1x16xf32, #tpu.memory_space<vmem>>, %arg5: memref<8x4x32xf32, #tpu.memory_space<vmem>>, %arg6: memref<1x32xf32, #tpu.memory_space<vmem>>, %arg7: memref<1x8x32xf32, #tpu.memory_space<vmem>>) attributes {dimension_semantics = [#tpu.dimension_semantics<parallel>], iteration_bounds = array<i64: 2>, scalar_prefetch = 0 : i64, scratch_operands = 0 : i64, tpu.core_type = #tpu.core_type<tc>, window_params = [{transform_indices = @transform_0, window_bounds = array<i64: 1, 8, 8, 4>}, {transform_indices = @transform_1, window_bounds = array<i64: 1, 8, 16, 4>}, {transform_indices = @transform_2, window_bounds = array<i64: 1, 8, 16, 4>}, {transform_indices = @transform_3, window_bounds = array<i64: 1, 1, 16>}, {pipeline_mode = #tpu.pipeline_mode<synchronous>, transform_indices = @transform_4, window_bounds = array<i64: 8, 4, 32>}, {pipeline_mode = #tpu.pipeline_mode<synchronous>, transform_indices = @transform_5, window_bounds = array<i64: 1, 32>}, {transform_indices = @transform_6, window_bounds = array<i64: 1, 8, 32>}]} {
    %c0 = arith.constant 0 : index
    %c0_0 = arith.constant 0 : index
    %c0_1 = arith.constant 0 : index
    %c0_2 = arith.constant 0 : index
    %0 = vector.load %arg1[%c0, %c0_0, %c0_1, %c0_2] : memref<1x8x8x4xf32, #tpu.memory_space<vmem>>, vector<1x8x8x4xf32>
    %1 = vector.shape_cast %0 : vector<1x8x8x4xf32> to vector<8x8x4xf32>
    %c0_3 = arith.constant 0 : index
    %c0_4 = arith.constant 0 : index
    %c0_5 = arith.constant 0 : index
    %c0_6 = arith.constant 0 : index
    %2 = vector.load %arg2[%c0_3, %c0_4, %c0_5, %c0_6] : memref<1x8x16x4xf32, #tpu.memory_space<vmem>>, vector<1x8x16x4xf32>
    %3 = vector.shape_cast %2 : vector<1x8x16x4xf32> to vector<8x16x4xf32>
    %c0_7 = arith.constant 0 : index
    %c0_8 = arith.constant 0 : index
    %c0_9 = arith.constant 0 : index
    %c0_10 = arith.constant 0 : index
    %4 = vector.load %arg3[%c0_7, %c0_8, %c0_9, %c0_10] : memref<1x8x16x4xf32, #tpu.memory_space<vmem>>, vector<1x8x16x4xf32>
    %5 = vector.shape_cast %4 : vector<1x8x16x4xf32> to vector<8x16x4xf32>
    %c0_11 = arith.constant 0 : index
    %c0_12 = arith.constant 0 : index
    %c0_13 = arith.constant 0 : index
    %6 = vector.load %arg4[%c0_11, %c0_12, %c0_13] : memref<1x1x16xf32, #tpu.memory_space<vmem>>, vector<1x1x16xf32>
    %7 = arith.truncf %1 : vector<8x8x4xf32> to vector<8x8x4xbf16>
    %8 = arith.truncf %3 : vector<8x16x4xf32> to vector<8x16x4xbf16>
    "tpu.trace_start"() <{level = 10 : i32, message = "hqd,hkd->hqk"}> : () -> ()
    %cst = arith.constant dense<0.000000e+00> : vector<8x8x16xf32>
    %9 = tpu.matmul %7, %8, %cst {dimension_numbers = #tpu.dot_dimension_numbers<[2], [2], [1], [1], [0, 0, 0, 1, 1, 1], [0], [0]>} : vector<8x8x4xbf16>, vector<8x16x4xbf16>, vector<8x8x16xf32> -> vector<8x8x16xf32>
    "tpu.trace_stop"() : () -> ()
    %cst_14 = arith.constant 1.000000e+00 : f32
    %10 = vector.broadcast %cst_14 : f32 to vector<1x1x16xf32>
    %11 = arith.subf %10, %6 : vector<1x1x16xf32>
    %cst_15 = arith.constant -1.000000e+04 : f32
    %12 = vector.broadcast %cst_15 : f32 to vector<1x1x16xf32>
    %13 = arith.mulf %11, %12 : vector<1x1x16xf32>
    %14 = vector.broadcast %13 : vector<1x1x16xf32> to vector<8x8x16xf32>
    %15 = arith.addf %9, %14 : vector<8x8x16xf32>
    %cst_16 = arith.constant dense<0xFF800000> : vector<8x8xf32>
    %16 = vector.multi_reduction <maximumf>, %15, %cst_16 [2] : vector<8x8x16xf32> to vector<8x8xf32>
    %17 = vector.shape_cast %16 : vector<8x8xf32> to vector<8x8x1xf32>
    %18 = vector.broadcast %17 : vector<8x8x1xf32> to vector<8x8x16xf32>
    %19 = arith.subf %15, %18 : vector<8x8x16xf32>
    %20 = math.exp %19 : vector<8x8x16xf32>
    %cst_17 = arith.constant dense<0.000000e+00> : vector<8x8xf32>
    %21 = vector.multi_reduction <add>, %20, %cst_17 [2] : vector<8x8x16xf32> to vector<8x8xf32>
    %22 = vector.shape_cast %21 : vector<8x8xf32> to vector<8x8x1xf32>
    %23 = tpu.reciprocal %22 {approx = true} : vector<8x8x1xf32> -> vector<8x8x1xf32>
    %24 = vector.broadcast %23 : vector<8x8x1xf32> to vector<8x8x16xf32>
    %25 = arith.mulf %20, %24 : vector<8x8x16xf32>
    %26 = arith.truncf %25 : vector<8x8x16xf32> to vector<8x8x16xbf16>
    %27 = arith.truncf %5 : vector<8x16x4xf32> to vector<8x16x4xbf16>
    "tpu.trace_start"() <{level = 10 : i32, message = "hqk,hkd->hqd"}> : () -> ()
    %cst_18 = arith.constant dense<0.000000e+00> : vector<8x8x4xf32>
    %28 = tpu.matmul %26, %27, %cst_18 {dimension_numbers = #tpu.dot_dimension_numbers<[2], [1], [1], [2], [0, 0, 0, 1, 1, 2], [0], [0]>} : vector<8x8x16xbf16>, vector<8x16x4xbf16>, vector<8x8x4xf32> -> vector<8x8x4xf32>
    "tpu.trace_stop"() : () -> ()
    %29 = arith.truncf %28 : vector<8x8x4xf32> to vector<8x8x4xbf16>
    %c0_19 = arith.constant 0 : index
    %c0_20 = arith.constant 0 : index
    %c0_21 = arith.constant 0 : index
    %30 = vector.load %arg5[%c0_19, %c0_20, %c0_21] : memref<8x4x32xf32, #tpu.memory_space<vmem>>, vector<8x4x32xf32>
    %31 = arith.truncf %30 : vector<8x4x32xf32> to vector<8x4x32xbf16>
    "tpu.trace_start"() <{level = 10 : i32, message = "hqd,hdn->hqn"}> : () -> ()
    %cst_22 = arith.constant dense<0.000000e+00> : vector<8x8x32xf32>
    %32 = tpu.matmul %29, %31, %cst_22 {dimension_numbers = #tpu.dot_dimension_numbers<[2], [1], [1], [2], [0, 0, 0, 1, 1, 2], [0], [0]>} : vector<8x8x4xbf16>, vector<8x4x32xbf16>, vector<8x8x32xf32> -> vector<8x8x32xf32>
    "tpu.trace_stop"() : () -> ()
    %cst_23 = arith.constant dense<0.000000e+00> : vector<8x32xf32>
    %33 = vector.multi_reduction <add>, %32, %cst_23 [0] : vector<8x8x32xf32> to vector<8x32xf32>
    %c0_24 = arith.constant 0 : index
    %c0_25 = arith.constant 0 : index
    %34 = vector.load %arg6[%c0_24, %c0_25] : memref<1x32xf32, #tpu.memory_space<vmem>>, vector<1x32xf32>
    %35 = vector.broadcast %34 : vector<1x32xf32> to vector<8x32xf32>
    %36 = arith.addf %33, %35 : vector<8x32xf32>
    %c0_26 = arith.constant 0 : index
    %c0_27 = arith.constant 0 : index
    %c0_28 = arith.constant 0 : index
    %37 = vector.load %arg7[%c0_26, %c0_27, %c0_28] : memref<1x8x32xf32, #tpu.memory_space<vmem>>, vector<1x8x32xf32>
    %38 = vector.shape_cast %37 : vector<1x8x32xf32> to vector<8x32xf32>
    %39 = vector.shape_cast %36 : vector<8x32xf32> to vector<1x8x32xf32>
    tpu.vector_store %arg7[%c0_26, %c0_27, %c0_28], %39 {strides = array<i32>} : memref<1x8x32xf32, #tpu.memory_space<vmem>>, vector<1x8x32xf32>,
    return
  }
  func.func @transform_0(%arg0: i32) -> (i32, i32, i32, i32) {
    %c0_i32 = arith.constant 0 : i32
    %c0_i32_0 = arith.constant 0 : i32
    %c0_i32_1 = arith.constant 0 : i32
    %c0_i32_2 = arith.constant 0 : i32
    return %arg0, %c0_i32, %c0_i32_0, %c0_i32_1 : i32, i32, i32, i32
  }
  func.func @transform_1(%arg0: i32) -> (i32, i32, i32, i32) {
    %c0_i32 = arith.constant 0 : i32
    %c0_i32_0 = arith.constant 0 : i32
    %c0_i32_1 = arith.constant 0 : i32
    %c0_i32_2 = arith.constant 0 : i32
    return %arg0, %c0_i32, %c0_i32_0, %c0_i32_1 : i32, i32, i32, i32
  }
  func.func @transform_2(%arg0: i32) -> (i32, i32, i32, i32) {
    %c0_i32 = arith.constant 0 : i32
    %c0_i32_0 = arith.constant 0 : i32
    %c0_i32_1 = arith.constant 0 : i32
    %c0_i32_2 = arith.constant 0 : i32
    return %arg0, %c0_i32, %c0_i32_0, %c0_i32_1 : i32, i32, i32, i32
  }
  func.func @transform_3(%arg0: i32) -> (i32, i32, i32) {
    %c0_i32 = arith.constant 0 : i32
    %c0_i32_0 = arith.constant 0 : i32
    %c0_i32_1 = arith.constant 0 : i32
    return %arg0, %c0_i32, %c0_i32_0 : i32, i32, i32
  }
  func.func @transform_4(%arg0: i32) -> (i32, i32, i32) {
    %c0_i32 = arith.constant 0 : i32
    %c0_i32_0 = arith.constant 0 : i32
    %c0_i32_1 = arith.constant 0 : i32
    %c0_i32_2 = arith.constant 0 : i32
    return %c0_i32, %c0_i32_0, %c0_i32_1 : i32, i32, i32
  }
  func.func @transform_5(%arg0: i32) -> (i32, i32) {
    %c0_i32 = arith.constant 0 : i32
    %c0_i32_0 = arith.constant 0 : i32
    %c0_i32_1 = arith.constant 0 : i32
    return %c0_i32, %c0_i32_0 : i32, i32
  }
  func.func @transform_6(%arg0: i32) -> (i32, i32, i32) {
    %c0_i32 = arith.constant 0 : i32
    %c0_i32_0 = arith.constant 0 : i32
    %c0_i32_1 = arith.constant 0 : i32
    return %arg0, %c0_i32, %c0_i32_0 : i32, i32, i32
  }
}

</mosaic_0001>

<bundles_post_ra>
// kernel: cross_attention_forward.4
= control target key start
LH: loop header
LB: loop body
LE: loop exit
PB: predicated region body
PF: predicated region fallthrough
CT: control target
= control target key end

     0   :  { %vm19_vm0 = vcmask 523264   ;;  %v153_v3 = vmov 0.0   ;;  %vm43_vm1 = vcmask 392192   ;;  %s231_s1 = inlined_call_operand.vmem [shape: f32[48,64], index: 1, kind: input, shape index: {}]   ;;  %s232_s0 = inlined_call_operand.vmem [shape: f32[32,48], index: 0, kind: input, shape index: {}]   ;;  %s233_s2 = inlined_call_operand.vmem [shape: f32[1,64], index: 2, kind: input, shape index: {}]   ;;  %s234_s3 = inlined_call_operand.vmem [shape: f32[32,64], index: 3, kind: output, shape index: {}]  }
   0x1   :  { %v38_v0 = vld [vmem:[%s231_s1 + $0x20] sm:$0xff]  ;;  %v39_v1 = vld [vmem:[%s231_s1 + $0x28] sm:$0xff]  ;;  %v36_v2 = vld [vmem:[%s231_s1 + $0x10] sm:$0xff]  ;;  %22 = vst.msk [vmem:[#allocation2 + $0x10] sm:$0xff] %vm19_vm0, %v153_v3 }
   0x2   :  { %20 = vst.msk [vmem:[#allocation2] sm:$0xff] %vm19_vm0, %v153_v3  ;;  %21 = vst.msk [vmem:[#allocation2 + $0x8] sm:$0xff] %vm19_vm0, %v153_v3  ;;  %v42_v4 = vpack.c.bf16 %v39_v1, %v38_v0  ;;  %v37_v5 = vld [vmem:[%s231_s1 + $0x18] sm:$0xff]  ;;  %v34_v6 = vld [vmem:[%s231_s1] sm:$0xff] }
   0x3   :  { %23 = vst.msk [vmem:[#allocation2 + $0x18] sm:$0xff] %vm19_vm0, %v153_v3  ;;  %v41_v7 = vpack.c.bf16 %v37_v5, %v36_v2  ;;  %v35_v8 = vld [vmem:[%s231_s1 + $0x8] sm:$0xff]  ;;  %v28_v9 = vld [vmem:[%s232_s0] sm:$0xff]  ;;  %v30_v13 = vld [vmem:[%s232_s0 + $0x10] sm:$0xff] }
   0x4   :  { %v29_v10 = vld [vmem:[%s232_s0 + $0x8] sm:$0xff]  ;;  %142 = vmatprep.subr.bf16.mxu0 %v42_v4  ;;  %v40_v12 = vpack.c.bf16 %v35_v8, %v34_v6  ;;  %v31_v14 = vld [vmem:[%s232_s0 + $0x18] sm:$0xff]  ;;  %v136_v28 = vld [vmem:[%s233_s2] ss:$0 sm:$0xff] }
   0x5   :  { %v32_v11 = vpack.c.bf16 %v29_v10, %v28_v9  ;;  %143 = vmatpush3.bf16.msra.mxu0 %v42_v4  ;;  %v33_v15 = vpack.c.bf16 %v31_v14, %v30_v13 }
   0x6   :  { %144 = vmatprep.subr.bf16.mxu0 %v41_v7 }
   0x7   :  { %148 = vmatprep.mubr.msk.bf16.mxu0 %vm43_vm1, %v32_v11 }
   0x8   :  { %v26_v16 = vld [vmem:[#allocation2 + $0x10] sm:$0xff] }
   0x9   :  { %145 = vmatpush3.bf16.msra.mxu0 %v41_v7  ;;  %v24_v18 = vld [vmem:[#allocation2] sm:$0xff]  ;;  %v25_v24 = vld [vmem:[#allocation2 + $0x8] sm:$0xff] }
   0xa   :  { %146 = vmatprep.subr.bf16.mxu0 %v40_v12  ;;  %v27_v21 = vld [vmem:[#allocation2 + $0x18] sm:$0xff] }
   0xd   :  { %147 = vmatpush3.bf16.msra.mxu0 %v40_v12 }
  0x10   :  { %149 = vmatmul.mubr.msk.bf16.vlgmr.msra.gmra.mxu0 %vm43_vm1, %v33_v15 }
  0xd0   :  { %v150_v17 = vpop.f32.mrf.mxu0 }
  0xd1   :  { %v101_v19 = vadd.f32 %v150_v17, %v26_v16 }
  0xd2   :  { %v84_v20 = vpop.f32.mrf.mxu0 }
  0xd3   :  { %106 = vst.msk [vmem:[#allocation2 + $0x10] sm:$0xff] %vm19_vm0, %v101_v19  ;;  %v99_v22 = vadd.f32 %v84_v20, %v24_v18 }
  0xd4   :  { %v151_v23 = vpop.f32.mrf.mxu0 }
  0xd5   :  { %104 = vst.msk [vmem:[#allocation2] sm:$0xff] %vm19_vm0, %v99_v22  ;;  %v102_v25 = vadd.f32 %v151_v23, %v27_v21 }
  0xd6   :  { %v87_v26 = vpop.f32.mrf.mxu0 }
  0xd7   :  { %107 = vst.msk [vmem:[#allocation2 + $0x18] sm:$0xff] %vm19_vm0, %v102_v25  ;;  %v100_v27 = vadd.f32 %v87_v26, %v25_v24 }
  0xd9   :  { %105 = vst.msk [vmem:[#allocation2 + $0x8] sm:$0xff] %vm19_vm0, %v100_v27 }
  0xda   :  { %v113_v29 = vld [vmem:[#allocation2 + $0x10] sm:$0xff] }
  0xdb   :  { %v124_v30 = vadd.f32 %v136_v28, %v113_v29 }
  0xdc   :  { %v111_v31 = vld [vmem:[#allocation2] sm:$0xff] }
  0xdd   :  { %128 = vst.msk [vmem:[%s234_s3 + $0x10] sm:$0xff] %vm19_vm0, %v124_v30  ;;  %v122_v32 = vadd.f32 %v136_v28, %v111_v31 }
  0xde   :  { %v114_v33 = vld [vmem:[#allocation2 + $0x18] sm:$0xff] }
  0xdf   :  { %126 = vst.msk [vmem:[%s234_s3] sm:$0xff] %vm19_vm0, %v122_v32  ;;  %v125_v34 = vadd.f32 %v136_v28, %v114_v33 }
  0xe0   :  { %v112_v35 = vld [vmem:[#allocation2 + $0x8] sm:$0xff] }
  0xe1   :  { %129 = vst.msk [vmem:[%s234_s3 + $0x18] sm:$0xff] %vm19_vm0, %v125_v34  ;;  %v123_v36 = vadd.f32 %v136_v28, %v112_v35 }
  0xe3   :  { %127 = vst.msk [vmem:[%s234_s3 + $0x8] sm:$0xff] %vm19_vm0, %v123_v36 }

// kernel: cross_attention_forward.3
= control target key start
LH: loop header
LB: loop body
LE: loop exit
PB: predicated region body
PF: predicated region fallthrough
CT: control target
= control target key end

     0   :  { %vm19_vm0 = vcmask 261120   ;;  %v117_v0 = vmov 0.0   ;;  %vm118_vm1 = vmmov 0   ;;  %s173_s1 = inlined_call_operand.vmem [shape: f32[32,32], index: 1, kind: input, shape index: {}]   ;;  %s174_s0 = inlined_call_operand.vmem [shape: f32[16,32], index: 0, kind: input, shape index: {}]   ;;  %s175_s2 = inlined_call_operand.vmem [shape: f32[1,32], index: 2, kind: input, shape index: {}]   ;;  %s176_s3 = inlined_call_operand.vmem [shape: f32[16,32], index: 3, kind: output, shape index: {}]  }
   0x1   :  { %107 = vmatprep.subr.bf16.mxu0 %v117_v0  ;;  %v29_v1 = vld [vmem:[%s173_s1 + $0x10] sm:$0xff]  ;;  %v30_v2 = vld [vmem:[%s173_s1 + $0x18] sm:$0xff]  ;;  %v27_v3 = vld [vmem:[%s173_s1] sm:$0xff]  ;;  %111 = vmatprep.mubr.msk.bf16.mxu0 %vm118_vm1, %v117_v0  ;;  %20 = vst.msk [vmem:[#allocation2] sm:$0xff] %vm19_vm0, %v117_v0 }
   0x2   :  { %21 = vst.msk [vmem:[#allocation2 + $0x8] sm:$0xff] %vm19_vm0, %v117_v0  ;;  %v32_v4 = vpack.c.bf16 %v30_v2, %v29_v1  ;;  %v28_v5 = vld [vmem:[%s173_s1 + $0x8] sm:$0xff]  ;;  %v24_v7 = vld [vmem:[%s174_s0] sm:$0xff] }
   0x3   :  { %v31_v6 = vpack.c.bf16 %v28_v5, %v27_v3  ;;  %v25_v8 = vld [vmem:[%s174_s0 + $0x8] sm:$0xff]  ;;  %v103_v18 = vld [vmem:[%s175_s2] ss:$0 sm:$0xff] }
   0x4   :  { %108 = vmatpush3.bf16.msra.mxu0 %v32_v4  ;;  %v26_v9 = vpack.c.bf16 %v25_v8, %v24_v7 }
   0x5   :  { %109 = vmatprep.subr.bf16.mxu0 %v117_v0 }
   0x8   :  { %110 = vmatpush3.bf16.msra.mxu0 %v31_v6  ;;  %v22_v10 = vld [vmem:[#allocation2] sm:$0xff] }
   0x9   :  { %v23_v14 = vld [vmem:[#allocation2 + $0x8] sm:$0xff] }
   0xb   :  { %112 = vmatmul.mubr.msk.bf16.vlgmr.msra.gmra.mxu0 %vm19_vm0, %v26_v9 }
  0xcb   :  { %v71_v11 = vpop.f32.mrf.mxu0 }
  0xcc   :  { %v78_v12 = vadd.f32 %v71_v11, %v22_v10 }
  0xcd   :  { %v113_v13 = vpop.f32.mrf.mxu0 }
  0xce   :  { %80 = vst.msk [vmem:[#allocation2] sm:$0xff] %vm19_vm0, %v78_v12 }
  0xcf   :  { %v74_v15 = vpop.f32.mrf.mxu0 }
  0xd0   :  { %v79_v16 = vadd.f32 %v74_v15, %v23_v14 }
  0xd1   :  { %v114_v17 = vpop.f32.mrf.mxu0 }
  0xd2   :  { %81 = vst.msk [vmem:[#allocation2 + $0x8] sm:$0xff] %vm19_vm0, %v79_v16 }
  0xd5   :  { %v85_v19 = vld [vmem:[#allocation2] sm:$0xff] }
  0xd6   :  { %v94_v20 = vadd.f32 %v103_v18, %v85_v19 }
  0xd8   :  { %96 = vst.msk [vmem:[%s176_s3] sm:$0xff] %vm19_vm0, %v94_v20 }
  0xd9   :  { %v86_v21 = vld [vmem:[#allocation2 + $0x8] sm:$0xff] }
  0xda   :  { %v95_v22 = vadd.f32 %v103_v18, %v86_v21 }
  0xdc   :  { %97 = vst.msk [vmem:[%s176_s3 + $0x8] sm:$0xff] %vm19_vm0, %v95_v22 }

// kernel: cross_attention_forward.5
= control target key start
LH: loop header
LB: loop body
LE: loop exit
PB: predicated region body
PF: predicated region fallthrough
CT: control target
= control target key end

     0   :  { %11 = vsyncpa [#allocation3], 0  ;;  %s2473_s0 = inlined_call_operand.vmem [shape: f32[2,8,8,4], index: 0, kind: input, shape index: {}]   ;;  %s2474_s1 = inlined_call_operand.vmem [shape: f32[2,8,16,4], index: 1, kind: input, shape index: {}]   ;;  %s2475_s2 = inlined_call_operand.vmem [shape: f32[2,8,16,4], index: 2, kind: input, shape index: {}]   ;;  %s2476_s3 = inlined_call_operand.vmem [shape: f32[2,1,16], index: 3, kind: input, shape index: {}]   ;;  %s2477_s4 = inlined_call_operand.vmem [shape: f32[8,4,32], index: 4, kind: input, shape index: {}]   ;;  %s2478_s5 = inlined_call_operand.vmem [shape: f32[1,32], index: 5, kind: input, shape index: {}]   ;;  %s2479_s6 = inlined_call_operand.hbm [shape: f32[2,8,32], index: 6, kind: output, shape index: {}]  }
   0x1   :  { %13 = vsyncpa [#allocation3 + $0x1], 0  ;;  %s2120_s21 = smov 0   ;;  %s2122_s22 = smov 0  }
   0x2   :  { %s2124_s23 = smov 0   ;;  %s2126_s24 = smov 0  }
   0x3 LB: > { %s2141_s25 = sadd.s32 4294967295, %s2080_s24   ;;  %s1712_s26 = sadd.s32 4294967294, %s2080_s24   ;;  %s2080_s24 = sphi %s2126_s24, %s2485_s24   ;;  %s2076_s23 = sphi %s2124_s23, %s2484_s23   ;;  %s2072_s22 = sphi %s2122_s22, %s2483_s22   ;;  %s2068_s21 = sphi %s2120_s21, %s2482_s21  }
   0x4   : > { %s2145_s27 = sadd.s32 1, %s2080_s24   ;;  %s172_s28 = sadd.s32 1, %s2076_s23 }
   0x5   : > { %s169_s29 = ssub.s32 %s2080_s24, %s2145_s27  ;;  %p182_p0 = scmp.ne.s32.totalorder %s2076_s23, %s2072_s22 }
   0x6   : > { %p170_p1 = scmp.eq.s32.totalorder %s169_s29, 0  ;;  %p183_p2 = scmp.eq.s32.totalorder %s2141_s25, 1 }
   0x7   : > { %p188_p3 = scmp.ne.s32.totalorder %s2072_s22, %s2068_s21  ;;  %p189_p4 = scmp.eq.s32.totalorder %s1712_s26, 1 }
   0x8   : > { %s2156_s30 = scalar_select %p170_p1, %s2076_s23, %s172_s28  }
   0x9   : > { %p2158_p5 = por %p183_p2, %p182_p0  ;;  %p2162_p6 = por %p189_p4, %p188_p3 }
   0xa   : > { %p1715_p7 = scmp.ge.s32.totalorder %s2080_s24, 1  ;;  %p243_p8 = scmp.lt.s32.totalorder %s2080_s24, 3 }
   0xc   : > { %p244_p9 = pnand %p1715_p7, %p243_p8 }
   0xd   : > { %p286_p10 = scmp.lt.s32.totalorder (!%p244_p9), %s2141_s25, 1 }
   0xe   : > { %247 = sbr.rel (%p244_p9) target bundleno = 977 (0x3d1), region = 44 }
  0x13   : > { %v2082_v0 = vmov 0.0   ;;  %s2172_s9 = scalar_select %p286_p10, %s2141_s25, 1  ;;  %vm2083_vm0 = vmmov 0   ;;  %vm370_vm1 = vcmask 31744   ;;  %v365_v49 = vlaneseq }
  0x14   : > { %1803 = vmatprep.subr.bf16.mxu0 %v2082_v0  ;;  %1809 = vmatprep.subr.bf16.mxu1 %v2082_v0  ;;  %vm739_vm2 = vcmask 130048   ;;  %vm1215_vm3 = vcmask 1041408   ;;  %vm1581_vm4 = vcmask 261120  }
  0x15   : > { %1805 = vmatprep.mubr.msk.bf16.mxu0 %vm2083_vm0, %v2082_v0  ;;  %1811 = vmatprep.mubr.msk.bf16.mxu1 %vm2083_vm0, %v2082_v0  ;;  %s1753_s10 = sshll.u32 %s2172_s9, 7  ;;  %s1752_s11 = sshll.u32 %s2172_s9, 6  ;;  %v366_v52 = vshrl.u32 %v365_v49, 7 }
  0x16   : > { %s2185_s14 = scalar_lea.vmem %s2474_s1, %s1753_s10  ;;  %s2194_s17 = scalar_lea.vmem %s2473_s0, %s1752_s11 }
  0x17   : > { %v313_v1 = vld [vmem:[%s2185_s14] sm:$0xff]  ;;  %v314_v2 = vld [vmem:[%s2185_s14 + $0x8] sm:$0xff]  ;;  %v315_v3 = vld [vmem:[%s2185_s14 + $0x10] sm:$0xff]  ;;  %s303_s20 = scalar_lea.vmem %s2476_s3, %s2172_s9  ;;  %v367_v54 = vsub.s32 0, %v366_v52  ;;  %s2294_s29 = scalar_lea.vmem %s2475_s2, %s1753_s10 }
  0x18   : > { %v354_v4 = vpack.c.bf16 %v314_v2, %v313_v1  ;;  %v316_v5 = vld [vmem:[%s2185_s14 + $0x18] sm:$0xff]  ;;  %v317_v7 = vld [vmem:[%s2185_s14 + $0x20] sm:$0xff]  ;;  %v318_v8 = vld [vmem:[%s2185_s14 + $0x28] sm:$0xff]  ;;  %s283_s10 = sand.u32 1, %s2072_s22  }
  0x19   : > { %v355_v6 = vpack.c.bf16 %v316_v5, %v315_v3  ;;  %v319_v10 = vld [vmem:[%s2185_s14 + $0x30] sm:$0xff]  ;;  %v320_v11 = vld [vmem:[%s2185_s14 + $0x38] sm:$0xff]  ;;  %v305_v13 = vld [vmem:[%s2194_s17] sm:$0xff]  ;;  %v356_v15 = vpack.c.bf16 %v318_v8, %v317_v7  ;;  %s1716_s11 = sshll.u32 %s283_s10, 3 }
  0x1a   : > { %v375_v9 = vsel %vm370_vm1, %v354_v4, 0  ;;  %v306_v14 = vld [vmem:[%s2194_s17 + $0x8] sm:$0xff]  ;;  %v357_v16 = vpack.c.bf16 %v320_v11, %v319_v10  ;;  %v346_v17 = vpack.c.bf16 %v305_v13, %v305_v13  ;;  %v321_v21 = vld [vmem:[%s2185_s14 + $0x40] sm:$0xff]  ;;  %v323_v23 = vld [vmem:[%s2185_s14 + $0x50] sm:$0xff]  ;;  %s285_s15 = scalar_lea.vmem [#allocation2], %s1716_s11 }
  0x1b   : > { %1804 = vmatpush3.bf16.xpose.msra.mxu0 %v375_v9  ;;  %v421_v12 = vsel %vm370_vm1, %v355_v6, 0  ;;  %v347_v18 = vpack.c.bf16 %v306_v14, %v306_v14  ;;  %v467_v19 = vsel %vm370_vm1, %v356_v15, 0  ;;  %v322_v22 = vld [vmem:[%s2185_s14 + $0x48] sm:$0xff]  ;;  %v324_v24 = vld [vmem:[%s2185_s14 + $0x58] sm:$0xff]  ;;  %v307_v25 = vld [vmem:[%s2194_s17 + $0x10] sm:$0xff]  ;;  %s1620_s16 = sshll.u32 %s285_s15, 4  ;;  %s1621_s16 = int_to_ptr.vmem [resolvable:$true] %s1620_s16 }
  0x1c   : > { %1810 = vmatpush3.bf16.xpose.msra.mxu1 %v421_v12  ;;  %1815 = vmatprep.subr.bf16.mxu0 %v2082_v0  ;;  %v513_v20 = vsel %vm370_vm1, %v357_v16, 0  ;;  %v308_v26 = vld [vmem:[%s2194_s17 + $0x18] sm:$0xff]  ;;  %v358_v27 = vpack.c.bf16 %v322_v22, %v321_v21  ;;  %v359_v28 = vpack.c.bf16 %v324_v24, %v323_v23  ;;  %v348_v29 = vpack.c.bf16 %v307_v25, %v307_v25  ;;  %v325_v33 = vld [vmem:[%s2185_s14 + $0x60] sm:$0xff]  ;;  %v326_v34 = vld [vmem:[%s2185_s14 + $0x68] sm:$0xff]  ;;  %s2020_s26 = scalar_lea.vmem %s1621_s16, 128 }
  0x1d   : > { %1821 = vmatprep.subr.bf16.mxu1 %v2082_v0  ;;  %v349_v30 = vpack.c.bf16 %v308_v26, %v308_v26  ;;  %v327_v35 = vld [vmem:[%s2185_s14 + $0x70] sm:$0xff]  ;;  %v328_v36 = vld [vmem:[%s2185_s14 + $0x78] sm:$0xff]  ;;  %v309_v37 = vld [vmem:[%s2194_s17 + $0x20] sm:$0xff]  ;;  %v360_v39 = vpack.c.bf16 %v326_v34, %v325_v33  ;;  %s1749_s14 = sshll.u32 %s2141_s25, 7  ;;  %p2021_p11 = scmp.ne.s32.totalorder %s1621_s16, %s2020_s26 }
  0x1e   : > { %v559_v31 = vsel %vm370_vm1, %v358_v27, 0  ;;  %v605_v32 = vsel %vm370_vm1, %v359_v28, 0  ;;  %v310_v38 = vld [vmem:[%s2194_s17 + $0x28] sm:$0xff]  ;;  %v361_v40 = vpack.c.bf16 %v328_v36, %v327_v35  ;;  %v350_v41 = vpack.c.bf16 %v309_v37, %v309_v37  ;;  %v311_v45 = vld [vmem:[%s2194_s17 + $0x30] sm:$0xff]  ;;  %v312_v46 = vld [vmem:[%s2194_s17 + $0x38] sm:$0xff]  ;;  %s2435_s19 = scalar_lea.hbm %s2479_s6, %s1749_s14  ;;  %s2084_s25 = smov [#allocation2]  }
  0x1f   : > { %v351_v42 = vpack.c.bf16 %v310_v38, %v310_v38  ;;  %v651_v43 = vsel %vm370_vm1, %v360_v39, 0  ;;  %v352_v47 = vpack.c.bf16 %v311_v45, %v311_v45  ;;  %v353_v48 = vpack.c.bf16 %v312_v46, %v312_v46  ;;  %v345_v50 = vld [vmem:[%s303_s20] sm:$0x1]  ;;  %s1607_s20 = scalar_lea.sflag [#allocation3], %s283_s10  ;;  %p2022_p12 = pnand %p2021_p11, %p2158_p5 }
  0x20   : > { %v697_v44 = vsel %vm370_vm1, %v361_v40, 0  ;;  %v362_v51 = vsub.f32 1.0, %v345_v50  ;;  %s2024_s28 = sshll.u32 %s2084_s25, 4  ;;  %s2025_s28 = int_to_ptr.vmem [resolvable:$false] %s2024_s28 }
  0x21   : > { %p2023_p13 = pneg %p2022_p12  ;;  %p2027_p0 = scmp.lt.s32.totalorder %s1621_s16, %s2025_s28 }
  0x22   : > { %1806 = vmatmul.mubr.msk.bf16.vlgmr.msra.gmra.mxu0 %vm370_vm1, %v346_v17  ;;  %v363_v53 = vmul.f32 -10000.0, %v362_v51 }
  0x23   : > { %1812 = vmatmul.mubr.msk.bf16.vlgmr.msra.gmra.mxu1 %vm370_vm1, %v347_v18  ;;  %1816 = vmatpush3.bf16.xpose.msra.mxu0 %v467_v19 }
  0x24   : > { %1822 = vmatpush3.bf16.xpose.msra.mxu1 %v513_v20  ;;  %1817 = vmatprep.mubr.msk.bf16.mxu0 %vm2083_vm0, %v2082_v0  ;;  %v368_v55 = vrot.slane %v363_v53, %v367_v54 }
  0x25   : > { %1823 = vmatprep.mubr.msk.bf16.mxu1 %vm2083_vm0, %v2082_v0  ;;  %1827 = vmatprep.subr.bf16.mxu0 %v2082_v0 }
  0x26   : > { %1833 = vmatprep.subr.bf16.mxu1 %v2082_v0 }
  0x2a   : > { %1818 = vmatmul.mubr.msk.bf16.vlgmr.msra.gmra.mxu0 %vm370_vm1, %v348_v29 }
  0x2b   : > { %1824 = vmatmul.mubr.msk.bf16.vlgmr.msra.gmra.mxu1 %vm370_vm1, %v349_v30  ;;  %1828 = vmatpush3.bf16.xpose.msra.mxu0 %v559_v31 }
  0x2c   : > { %1834 = vmatpush3.bf16.xpose.msra.mxu1 %v605_v32  ;;  %1829 = vmatprep.mubr.msk.bf16.mxu0 %vm2083_vm0, %v2082_v0 }
  0x2d   : > { %1835 = vmatprep.mubr.msk.bf16.mxu1 %vm2083_vm0, %v2082_v0  ;;  %1839 = vmatprep.subr.bf16.mxu0 %v2082_v0 }
  0x2e   : > { %1845 = vmatprep.subr.bf16.mxu1 %v2082_v0 }
  0x32   : > { %1830 = vmatmul.mubr.msk.bf16.vlgmr.msra.gmra.mxu0 %vm370_vm1, %v350_v41 }
  0x33   : > { %1836 = vmatmul.mubr.msk.bf16.vlgmr.msra.gmra.mxu1 %vm370_vm1, %v351_v42  ;;  %1840 = vmatpush3.bf16.xpose.msra.mxu0 %v651_v43 }
  0x34   : > { %1846 = vmatpush3.bf16.xpose.msra.mxu1 %v697_v44  ;;  %1841 = vmatprep.mubr.msk.bf16.mxu0 %vm2083_vm0, %v2082_v0 }
  0x35   : > { %1847 = vmatprep.mubr.msk.bf16.mxu1 %vm2083_vm0, %v2082_v0  ;;  %1851 = vmatprep.subr.bf16.mxu0 %v2082_v0 }
  0x36   : > { %1857 = vmatprep.subr.bf16.mxu1 %v2082_v0 }
  0x3a   : > { %1842 = vmatmul.mubr.msk.bf16.vlgmr.msra.gmra.mxu0 %vm370_vm1, %v352_v47 }
  0x3b   : > { %1848 = vmatmul.mubr.msk.bf16.vlgmr.msra.gmra.mxu1 %vm370_vm1, %v353_v48  ;;  %1853 = vmatprep.mubr.msk.bf16.mxu0 %vm2083_vm0, %v2082_v0 }
  0x3c   : > { %1859 = vmatprep.mubr.msk.bf16.mxu1 %vm2083_vm0, %v2082_v0 }
  0xe2   : > { %v411_v56 = vpop.f32.mrf.mxu0 }
  0xe3   : > { %v412_v57 = vadd.f32 %v411_v56, %v368_v55  ;;  %v457_v58 = vpop.f32.mrf.mxu1 }
  0xe4   : > { %v458_v59 = vadd.f32 %v457_v58, %v368_v55  ;;  %v1807_v60 = vpop.f32.mrf.mxu0 }
  0xe5   : > { %v1813_v61 = vpop.f32.mrf.mxu1  ;;  %v740_v62 = vsel %vm739_vm2, %v412_v57, -inf }
  0xe6   : > { %741 = vmax.xlane.f32.xlu0 %v740_v62  ;;  %v414_v63 = vpop.f32.mrf.mxu0  ;;  %v743_v2 = vsel %vm739_vm2, %v458_v59, -inf }
  0xe7   : > { %v460_v1 = vpop.f32.mrf.mxu1 }
  0xe8   : > { %v1808_v3 = vpop.f32.mrf.mxu0 }
  0xe9   : > { %v1814_v4 = vpop.f32.mrf.mxu1 }
  0xea   : > { %744 = vmax.xlane.f32.xlu0 %v743_v2  ;;  %v503_v5 = vpop.f32.mrf.mxu0 }
  0xeb   : > { %v549_v6 = vpop.f32.mrf.mxu1  ;;  %v504_v7 = vadd.f32 %v503_v5, %v368_v55 }
  0xec   : > { %v550_v8 = vadd.f32 %v549_v6, %v368_v55  ;;  %v1819_v9 = vpop.f32.mrf.mxu0 }
  0xed   : > { %v1825_v10 = vpop.f32.mrf.mxu1  ;;  %v746_v11 = vsel %vm739_vm2, %v504_v7, -inf }
  0xee   : > { %747 = vmax.xlane.f32.xlu1 %v746_v11  ;;  %v506_v12 = vpop.f32.mrf.mxu0  ;;  %v749_v14 = vsel %vm739_vm2, %v550_v8, -inf }
  0xef   : > { %v552_v13 = vpop.f32.mrf.mxu1 }
  0xf0   : > { %v1820_v15 = vpop.f32.mrf.mxu0 }
  0xf1   : > { %v1826_v16 = vpop.f32.mrf.mxu1  ;;  %v329_v15 = vld [vmem:[%s2294_s29] sm:$0xff] }
  0xf2   : > { %750 = vmax.xlane.f32.xlu1 %v749_v14  ;;  %v595_v17 = vpop.f32.mrf.mxu0  ;;  %v330_v16 = vld [vmem:[%s2294_s29 + $0x8] sm:$0xff] }
  0xf3   : > { %v641_v18 = vpop.f32.mrf.mxu1  ;;  %v596_v19 = vadd.f32 %v595_v17, %v368_v55  ;;  %v331_v17 = vld [vmem:[%s2294_s29 + $0x10] sm:$0xff] }
  0xf4   : > { %v642_v20 = vadd.f32 %v641_v18, %v368_v55  ;;  %v1831_v21 = vpop.f32.mrf.mxu0 }
  0xf5   : > { %v1837_v22 = vpop.f32.mrf.mxu1  ;;  %v752_v23 = vsel %vm739_vm2, %v596_v19, -inf  ;;  %v332_v21 = vld [vmem:[%s2294_s29 + $0x18] sm:$0xff] }
  0xf6   : > { %v755_v24 = vsel %vm739_vm2, %v642_v20, -inf  ;;  %753 = vmax.xlane.f32.xlu0 %v752_v23  ;;  %v598_v25 = vpop.f32.mrf.mxu0  ;;  %v837_v23 = vpack.c.bf16 %v332_v21, %v331_v17  ;;  %v1198_v17 = vld [vmem:[%s2477_s4 + $0x8] sm:$0xf] }
  0xf7   : > { %v644_v26 = vpop.f32.mrf.mxu1  ;;  %756 = vmax.xlane.f32.xlu1 %v755_v24 }
  0xf8   : > { %v1832_v27 = vpop.f32.mrf.mxu0  ;;  %1858 = vmatpush3.bf16.msra.mxu1 %v837_v23 }
  0xf9   : > { %v1838_v28 = vpop.f32.mrf.mxu1  ;;  %1869 = vmatprep.subr.bf16.mxu1 %v2082_v0 }
  0xfa   : > { %v687_v29 = vpop.f32.mrf.mxu0  ;;  %v333_v28 = vld [vmem:[%s2294_s29 + $0x20] sm:$0xff] }
  0xfb   : > { %v688_v30 = vadd.f32 %v687_v29, %v368_v55  ;;  %v733_v31 = vpop.f32.mrf.mxu1  ;;  %v334_v29 = vld [vmem:[%s2294_s29 + $0x28] sm:$0xff] }
  0xfc   : > { %v734_v32 = vadd.f32 %v733_v31, %v368_v55  ;;  %v1843_v33 = vpop.f32.mrf.mxu0 }
  0xfd   : > { %v1849_v34 = vpop.f32.mrf.mxu1  ;;  %v758_v35 = vsel %vm739_vm2, %v688_v30, -inf  ;;  %v838_v33 = vpack.c.bf16 %v334_v29, %v333_v28 }
  0xfe   : > { %v761_v36 = vsel %vm739_vm2, %v734_v32, -inf  ;;  %759 = vmax.xlane.f32.xlu0 %v758_v35  ;;  %v690_v37 = vpop.f32.mrf.mxu0 }
  0xff   : > { %v736_v38 = vpop.f32.mrf.mxu1  ;;  %762 = vmax.xlane.f32.xlu1 %v761_v36  ;;  %v335_v36 = vld [vmem:[%s2294_s29 + $0x30] sm:$0xff]  ;;  %v336_v37 = vld [vmem:[%s2294_s29 + $0x38] sm:$0xff] }
 0x100   : > { %v1844_v39 = vpop.f32.mrf.mxu0 }
 0x101   : > { %v1850_v40 = vpop.f32.mrf.mxu1 }
 0x102   : > { %v839_v40 = vpack.c.bf16 %v336_v37, %v335_v36 }
 0x16f   : > { %v742_v41 = vpop.xlane.xlu0 %741 }
 0x170   : > { %v764_v42 = vsub.f32 %v412_v57, %v742_v41 }
 0x172   : > { %v772_v43 = vmul.f32 1.442695, %v764_v42  ;;  %v337_v42 = vld [vmem:[%s2294_s29 + $0x40] sm:$0xff] }
 0x173   : > { %v745_v44 = vpop.xlane.xlu0 %744 }
 0x174   : > { %1988 = vpow2.f32 %v772_v43  ;;  %v765_v45 = vsub.f32 %v458_v59, %v745_v44  ;;  %v338_v43 = vld [vmem:[%s2294_s29 + $0x48] sm:$0xff] }
 0x176   : > { %v774_v46 = vmul.f32 1.442695, %v765_v45 }
 0x177   : > { %v748_v47 = vpop.xlane.xlu1 %747 }
 0x178   : > { %1990 = vpow2.f32 %v774_v46  ;;  %v766_v48 = vsub.f32 %v504_v7, %v748_v47  ;;  %v840_v47 = vpack.c.bf16 %v338_v43, %v337_v42 }
 0x17a   : > { %v776_v49 = vmul.f32 1.442695, %v766_v48 }
 0x17b   : > { %v751_v50 = vpop.xlane.xlu1 %750 }
 0x17c   : > { %1992 = vpow2.f32 %v776_v49  ;;  %v767_v51 = vsub.f32 %v550_v8, %v751_v50  ;;  %v339_v50 = vld [vmem:[%s2294_s29 + $0x50] sm:$0xff] }
 0x17e   : > { %v778_v52 = vmul.f32 1.442695, %v767_v51  ;;  %v340_v51 = vld [vmem:[%s2294_s29 + $0x58] sm:$0xff] }
 0x17f   : > { %v754_v53 = vpop.xlane.xlu0 %753 }
 0x180   : > { %1994 = vpow2.f32 %v778_v52  ;;  %v757_v54 = vpop.xlane.xlu1 %756  ;;  %v768_v55 = vsub.f32 %v596_v19, %v754_v53 }
 0x181   : > { %v1989_v56 = vpop.eup %1988  ;;  %v769_v58 = vsub.f32 %v642_v20, %v757_v54  ;;  %v836_v20 = vpack.c.bf16 %v330_v16, %v329_v15  ;;  %v841_v54 = vpack.c.bf16 %v340_v51, %v339_v50 }
 0x182   : > { %v780_v57 = vmul.f32 1.442695, %v768_v55  ;;  %v788_v60 = vsel %vm739_vm2, %v1989_v56, 0.0 }
 0x183   : > { %v782_v61 = vmul.f32 1.442695, %v769_v58  ;;  %789 = vadd.xlane.f32.xlu0 %v788_v60  ;;  %1852 = vmatpush3.bf16.msra.mxu0 %v836_v20  ;;  %v342_v58 = vld [vmem:[%s2294_s29 + $0x68] sm:$0xff] }
 0x184   : > { %1996 = vpow2.f32 %v780_v57  ;;  %1863 = vmatprep.subr.bf16.mxu0 %v2082_v0 }
 0x185   : > { %v2269_v59 = vpop.eup %1990  ;;  %1998 = vpow2.f32 %v782_v61 }
 0x186   : > { %v791_v62 = vsel %vm739_vm2, %v2269_v59, 0.0 }
 0x187   : > { %792 = vadd.xlane.f32.xlu1 %v791_v62  ;;  %v760_v63 = vpop.xlane.xlu0 %759 }
 0x188   : > { %v763_v1 = vpop.xlane.xlu1 %762  ;;  %v770_v2 = vsub.f32 %v688_v30, %v760_v63 }
 0x189   : > { %v2273_v3 = vpop.eup %1992  ;;  %v771_v4 = vsub.f32 %v734_v32, %v763_v1  ;;  %v343_v1 = vld [vmem:[%s2294_s29 + $0x70] sm:$0xff] }
 0x18a   : > { %v784_v5 = vmul.f32 1.442695, %v770_v2  ;;  %v794_v6 = vsel %vm739_vm2, %v2273_v3, 0.0  ;;  %v344_v2 = vld [vmem:[%s2294_s29 + $0x78] sm:$0xff] }
 0x18b   : > { %v786_v7 = vmul.f32 1.442695, %v771_v4  ;;  %795 = vadd.xlane.f32.xlu0 %v794_v6  ;;  %v843_v4 = vpack.c.bf16 %v344_v2, %v343_v1 }
 0x18c   : > { %2000 = vpow2.f32 %v784_v5 }
 0x18d   : > { %v2277_v8 = vpop.eup %1994  ;;  %2002 = vpow2.f32 %v786_v7 }
 0x18e   : > { %v797_v9 = vsel %vm739_vm2, %v2277_v8, 0.0 }
 0x18f   : > { %798 = vadd.xlane.f32.xlu1 %v797_v9 }
 0x191   : > { %v2281_v10 = vpop.eup %1996 }
 0x192   : > { %v2283_v11 = vpop.eup %1998  ;;  %v800_v12 = vsel %vm739_vm2, %v2281_v10, 0.0 }
 0x193   : > { %v803_v13 = vsel %vm739_vm2, %v2283_v11, 0.0  ;;  %801 = vadd.xlane.f32.xlu0 %v800_v12 }
 0x194   : > { %804 = vadd.xlane.f32.xlu1 %v803_v13 }
 0x199   : > { %v2296_v14 = vpop.eup %2000 }
 0x19a   : > { %v2301_v18 = vpop.eup %2002  ;;  %v806_v19 = vsel %vm739_vm2, %v2296_v14, 0.0 }
 0x19b   : > { %v809_v22 = vsel %vm739_vm2, %v2301_v18, 0.0  ;;  %807 = vadd.xlane.f32.xlu0 %v806_v19  ;;  %v1199_v19 = vld [vmem:[%s2477_s4 + $0xc] sm:$0xf] }
 0x19c   : > { %810 = vadd.xlane.f32.xlu1 %v809_v22  ;;  %v1207_v23 = vpack.c.bf16 %v1199_v19, %v1199_v19 }
 0x19e   : > { %v1355_v29 = vsel %vm1215_vm3, %v1207_v23, 0 }
 0x20c   : > { %v790_v24 = vpop.xlane.xlu0 %789 }
 0x20d   : > { %2004 = vrcp.f32 %v790_v24 }
 0x210   : > { %v793_v25 = vpop.xlane.xlu1 %792 }
 0x211   : > { %2006 = vrcp.f32 %v793_v25  ;;  %v1200_v25 = vld [vmem:[%s2477_s4 + $0x10] sm:$0xf] }
 0x214   : > { %v796_v26 = vpop.xlane.xlu0 %795 }
 0x215   : > { %2008 = vrcp.f32 %v796_v26 }
 0x218   : > { %v799_v27 = vpop.xlane.xlu1 %798 }
 0x219   : > { %2010 = vrcp.f32 %v799_v27 }
 0x21a   : > { %v2005_v30 = vpop.eup %2004 }
 0x21b   : > { %v820_v31 = vmul.f32 %v2005_v30, %v1989_v56  ;;  %v341_v56 = vld [vmem:[%s2294_s29 + $0x60] sm:$0xff]  ;;  %v1208_v30 = vpack.c.bf16 %v1200_v25, %v1200_v25  ;;  %s2026_s29 = scalar_lea.vmem %s2025_s28, 256 }
 0x21c   : > { %v802_v32 = vpop.xlane.xlu0 %801  ;;  %p2028_p1 = scmp.lt.s32.totalorder %s2026_s29, %s2020_s26 }
 0x21d   : > { %v805_v34 = vpop.xlane.xlu1 %804  ;;  %2012 = vrcp.f32 %v802_v32  ;;  %v828_v35 = vpack.c.bf16 %v820_v31, %v820_v31  ;;  %v1401_v37 = vsel %vm1215_vm3, %v1208_v30, 0 }
 0x21e   : > { %v2007_v38 = vpop.eup %2006  ;;  %2014 = vrcp.f32 %v805_v34  ;;  %p2029_p2 = por %p2028_p1, %p2027_p0 }
 0x21f   : > { %1854 = vmatmul.mubr.msk.bf16.vlgmr.msra.gmra.mxu0 %vm739_vm2, %v828_v35  ;;  %v821_v39 = vmul.f32 %v2007_v38, %v2269_v59  ;;  %v842_v59 = vpack.c.bf16 %v342_v58, %v341_v56 }
 0x220   : > { %1864 = vmatpush3.bf16.msra.mxu0 %v838_v33  ;;  %1865 = vmatprep.mubr.msk.bf16.mxu0 %vm2083_vm0, %v2082_v0  ;;  %v1201_v33 = vld [vmem:[%s2477_s4 + $0x14] sm:$0xf]  ;;  %p2030_p3 = pnand %p2029_p2, %p2023_p13 }
 0x221   : > { %v829_v41 = vpack.c.bf16 %v821_v39, %v821_v39  ;;  %1875 = vmatprep.subr.bf16.mxu0 %v2082_v0  ;;  %v1209_v38 = vpack.c.bf16 %v1201_v33, %v1201_v33 }
 0x222   : > { %v2009_v44 = vpop.eup %2008 }
 0x223   : > { %1860 = vmatmul.mubr.msk.bf16.vlgmr.msra.gmra.mxu1 %vm739_vm2, %v829_v41  ;;  %v822_v45 = vmul.f32 %v2009_v44, %v2273_v3  ;;  %v1196_v3 = vld [vmem:[%s2477_s4] sm:$0xf]  ;;  %v1202_v41 = vld [vmem:[%s2477_s4 + $0x18] sm:$0xf] }
 0x224   : > { %1870 = vmatpush3.bf16.msra.mxu1 %v839_v40  ;;  %v808_v46 = vpop.xlane.xlu0 %807  ;;  %1871 = vmatprep.mubr.msk.bf16.mxu1 %vm2083_vm0, %v2082_v0  ;;  %v1204_v6 = vpack.c.bf16 %v1196_v3, %v1196_v3 }
 0x225   : > { %v811_v48 = vpop.xlane.xlu1 %810  ;;  %2016 = vrcp.f32 %v808_v46  ;;  %v830_v49 = vpack.c.bf16 %v822_v45, %v822_v45  ;;  %1881 = vmatprep.subr.bf16.mxu1 %v2082_v0  ;;  %v1447_v45 = vsel %vm1215_vm3, %v1209_v38, 0  ;;  %v1210_v46 = vpack.c.bf16 %v1202_v41, %v1202_v41 }
 0x226   : > { %v2011_v52 = vpop.eup %2010  ;;  %2018 = vrcp.f32 %v811_v48  ;;  %v1217_v12 = vsel %vm1215_vm3, %v1204_v6, 0 }
 0x227   : > { %1866 = vmatmul.mubr.msk.bf16.vlgmr.msra.gmra.mxu0 %vm739_vm2, %v830_v49  ;;  %v823_v53 = vmul.f32 %v2011_v52, %v2277_v8  ;;  %v1203_v49 = vld [vmem:[%s2477_s4 + $0x1c] sm:$0xf] }
 0x228   : > { %1876 = vmatpush3.bf16.msra.mxu0 %v840_v47  ;;  %1877 = vmatprep.mubr.msk.bf16.mxu0 %vm2083_vm0, %v2082_v0 }
 0x229   : > { %v831_v55 = vpack.c.bf16 %v823_v53, %v823_v53  ;;  %1887 = vmatprep.subr.bf16.mxu0 %v2082_v0  ;;  %v1493_v53 = vsel %vm1215_vm3, %v1210_v46, 0 }
 0x22a   : > { %v2013_v57 = vpop.eup %2012 }
 0x22b   : > { %v2015_v60 = vpop.eup %2014  ;;  %1872 = vmatmul.mubr.msk.bf16.vlgmr.msra.gmra.mxu1 %vm739_vm2, %v831_v55  ;;  %v824_v61 = vmul.f32 %v2013_v57, %v2281_v10 }
 0x22c   : > { %1882 = vmatpush3.bf16.msra.mxu1 %v841_v54  ;;  %1883 = vmatprep.mubr.msk.bf16.mxu1 %vm2083_vm0, %v2082_v0  ;;  %v825_v63 = vmul.f32 %v2015_v60, %v2283_v11  ;;  %v1211_v54 = vpack.c.bf16 %v1203_v49, %v1203_v49 }
 0x22d   : > { %v832_v62 = vpack.c.bf16 %v824_v61, %v824_v61  ;;  %1893 = vmatprep.subr.bf16.mxu1 %v2082_v0 }
 0x22e   : > { %v833_v5 = vpack.c.bf16 %v825_v63, %v825_v63  ;;  %v1539_v61 = vsel %vm1215_vm3, %v1211_v54, 0 }
 0x22f   : > { %1878 = vmatmul.mubr.msk.bf16.vlgmr.msra.gmra.mxu0 %vm739_vm2, %v832_v62 }
 0x230   : > { %1888 = vmatpush3.bf16.msra.mxu0 %v842_v59  ;;  %1889 = vmatprep.mubr.msk.bf16.mxu0 %vm2083_vm0, %v2082_v0 }
 0x231   : > { %1899 = vmatprep.subr.bf16.mxu0 %v2082_v0 }
 0x232   : > { %v2017_v7 = vpop.eup %2016 }
 0x233   : > { %v2019_v8 = vpop.eup %2018  ;;  %1884 = vmatmul.mubr.msk.bf16.vlgmr.msra.gmra.mxu1 %vm739_vm2, %v833_v5  ;;  %v826_v9 = vmul.f32 %v2017_v7, %v2296_v14  ;;  %v1197_v14 = vld [vmem:[%s2477_s4 + $0x4] sm:$0xf] }
 0x234   : > { %1894 = vmatpush3.bf16.msra.mxu1 %v843_v4  ;;  %1895 = vmatprep.mubr.msk.bf16.mxu1 %vm2083_vm0, %v2082_v0  ;;  %v827_v11 = vmul.f32 %v2019_v8, %v2301_v18  ;;  %v1205_v15 = vpack.c.bf16 %v1197_v14, %v1197_v14  ;;  %v1206_v18 = vpack.c.bf16 %v1198_v17, %v1198_v17 }
 0x235   : > { %v834_v10 = vpack.c.bf16 %v826_v9, %v826_v9  ;;  %1905 = vmatprep.subr.bf16.mxu1 %v2082_v0 }
 0x236   : > { %v835_v13 = vpack.c.bf16 %v827_v11, %v827_v11  ;;  %v1263_v16 = vsel %vm1215_vm3, %v1205_v15, 0  ;;  %v1309_v22 = vsel %vm1215_vm3, %v1206_v18, 0 }
 0x237   : > { %1890 = vmatmul.mubr.msk.bf16.vlgmr.msra.gmra.mxu0 %vm739_vm2, %v834_v10 }
 0x238   : > { %1900 = vmatpush3.bf16.msra.mxu0 %v1217_v12  ;;  %1901 = vmatprep.mubr.msk.bf16.mxu0 %vm2083_vm0, %v2082_v0 }
 0x239   : > { %1911 = vmatprep.subr.bf16.mxu0 %v2082_v0 }
 0x23b   : > { %1896 = vmatmul.mubr.msk.bf16.vlgmr.msra.gmra.mxu1 %vm739_vm2, %v835_v13 }
 0x23c   : > { %1907 = vmatprep.mubr.msk.bf16.mxu1 %vm2083_vm0, %v2082_v0  ;;  %1906 = vmatpush3.bf16.msra.mxu1 %v1263_v16 }
 0x23d   : > { %1917 = vmatprep.subr.bf16.mxu1 %v2082_v0 }
 0x2df   : > { %v881_v20 = vpop.f32.mrf.mxu0 }
 0x2e0   : > { %v1188_v21 = vpack.c.bf16 %v881_v20, %v881_v20 }
 0x2e1   : > { %v1855_v24 = vpop.f32.mrf.mxu0 }
 0x2e2   : > { %1902 = vmatmul.mubr.msk.bf16.vlgmr.msra.gmra.mxu0 %vm370_vm1, %v1188_v21 }
 0x2e3   : > { %v884_v26 = vpop.f32.mrf.mxu0  ;;  %v924_v27 = vpop.f32.mrf.mxu1  ;;  %1912 = vmatpush3.bf16.msra.mxu0 %v1309_v22  ;;  %1913 = vmatprep.mubr.msk.bf16.mxu0 %vm2083_vm0, %v2082_v0 }
 0x2e4   : > { %v1189_v28 = vpack.c.bf16 %v924_v27, %v924_v27  ;;  %1923 = vmatprep.subr.bf16.mxu0 %v2082_v0 }
 0x2e5   : > { %v1856_v31 = vpop.f32.mrf.mxu0  ;;  %v1861_v32 = vpop.f32.mrf.mxu1 }
 0x2e6   : > { %1908 = vmatmul.mubr.msk.bf16.vlgmr.msra.gmra.mxu1 %vm370_vm1, %v1189_v28 }
 0x2e7   : > { %v927_v34 = vpop.f32.mrf.mxu1  ;;  %v967_v35 = vpop.f32.mrf.mxu0  ;;  %1918 = vmatpush3.bf16.msra.mxu1 %v1355_v29  ;;  %1919 = vmatprep.mubr.msk.bf16.mxu1 %vm2083_vm0, %v2082_v0 }
 0x2e8   : > { %v1190_v36 = vpack.c.bf16 %v967_v35, %v967_v35  ;;  %1929 = vmatprep.subr.bf16.mxu1 %v2082_v0 }
 0x2e9   : > { %v1862_v39 = vpop.f32.mrf.mxu1  ;;  %v1867_v40 = vpop.f32.mrf.mxu0 }
 0x2ea   : > { %1914 = vmatmul.mubr.msk.bf16.vlgmr.msra.gmra.mxu0 %vm370_vm1, %v1190_v36 }
 0x2eb   : > { %v970_v42 = vpop.f32.mrf.mxu0  ;;  %v1010_v43 = vpop.f32.mrf.mxu1  ;;  %1924 = vmatpush3.bf16.msra.mxu0 %v1401_v37  ;;  %1925 = vmatprep.mubr.msk.bf16.mxu0 %vm2083_vm0, %v2082_v0 }
 0x2ec   : > { %v1191_v44 = vpack.c.bf16 %v1010_v43, %v1010_v43  ;;  %1935 = vmatprep.subr.bf16.mxu0 %v2082_v0 }
 0x2ed   : > { %v1868_v47 = vpop.f32.mrf.mxu0  ;;  %v1873_v48 = vpop.f32.mrf.mxu1 }
 0x2ee   : > { %1920 = vmatmul.mubr.msk.bf16.vlgmr.msra.gmra.mxu1 %vm370_vm1, %v1191_v44 }
 0x2ef   : > { %v1013_v50 = vpop.f32.mrf.mxu1  ;;  %v1053_v51 = vpop.f32.mrf.mxu0  ;;  %1930 = vmatpush3.bf16.msra.mxu1 %v1447_v45  ;;  %1931 = vmatprep.mubr.msk.bf16.mxu1 %vm2083_vm0, %v2082_v0 }
 0x2f0   : > { %v1192_v52 = vpack.c.bf16 %v1053_v51, %v1053_v51  ;;  %1941 = vmatprep.subr.bf16.mxu1 %v2082_v0 }
 0x2f1   : > { %v1874_v55 = vpop.f32.mrf.mxu1  ;;  %v1879_v56 = vpop.f32.mrf.mxu0 }
 0x2f2   : > { %1926 = vmatmul.mubr.msk.bf16.vlgmr.msra.gmra.mxu0 %vm370_vm1, %v1192_v52 }
 0x2f3   : > { %v1056_v58 = vpop.f32.mrf.mxu0  ;;  %v1096_v57 = vpop.f32.mrf.mxu1  ;;  %1936 = vmatpush3.bf16.msra.mxu0 %v1493_v53  ;;  %1937 = vmatprep.mubr.msk.bf16.mxu0 %vm2083_vm0, %v2082_v0  ;;  %v1747_v53 = vld [vmem:[%s2478_s5] ss:$0 sm:$0xff] }
 0x2f4   : > { %v1193_v60 = vpack.c.bf16 %v1096_v57, %v1096_v57 }
 0x2f5   : > { %v1880_v59 = vpop.f32.mrf.mxu0  ;;  %v1885_v62 = vpop.f32.mrf.mxu1 }
 0x2f6   : > { %1932 = vmatmul.mubr.msk.bf16.vlgmr.msra.gmra.mxu1 %vm370_vm1, %v1193_v60 }
 0x2f7   : > { %v1099_v63 = vpop.f32.mrf.mxu1  ;;  %v1139_v1 = vpop.f32.mrf.mxu0  ;;  %1942 = vmatpush3.bf16.msra.mxu1 %v1539_v61  ;;  %1943 = vmatprep.mubr.msk.bf16.mxu1 %vm2083_vm0, %v2082_v0 }
 0x2f8   : > { %v1194_v2 = vpack.c.bf16 %v1139_v1, %v1139_v1 }
 0x2f9   : > { %v1886_v3 = vpop.f32.mrf.mxu1  ;;  %v1891_v4 = vpop.f32.mrf.mxu0 }
 0x2fa   : > { %1938 = vmatmul.mubr.msk.bf16.vlgmr.msra.gmra.mxu0 %vm370_vm1, %v1194_v2 }
 0x2fb   : > { %v1142_v5 = vpop.f32.mrf.mxu0  ;;  %v1182_v6 = vpop.f32.mrf.mxu1 }
 0x2fc   : > { %v1195_v7 = vpack.c.bf16 %v1182_v6, %v1182_v6 }
 0x2fd   : > { %v1892_v8 = vpop.f32.mrf.mxu0  ;;  %v1897_v9 = vpop.f32.mrf.mxu1 }
 0x2fe   : > { %1944 = vmatmul.mubr.msk.bf16.vlgmr.msra.gmra.mxu1 %vm370_vm1, %v1195_v7 }
 0x2ff   : > { %v1185_v10 = vpop.f32.mrf.mxu1 }
 0x301   : > { %v1898_v11 = vpop.f32.mrf.mxu1 }
 0x3a2   : > { %v1253_v12 = vpop.f32.mrf.mxu0 }
 0x3a3   : > { %v1582_v28 = vsel %vm1581_vm4, %v1253_v12, 0.0 }
 0x3a4   : > { %v1903_v13 = vpop.f32.mrf.mxu0 }
 0x3a6   : > { %v1256_v14 = vpop.f32.mrf.mxu0  ;;  %v1299_v15 = vpop.f32.mrf.mxu1 }
 0x3a7   : > { %v1583_v25 = vsel %vm1581_vm4, %v1299_v15, 0.0 }
 0x3a8   : > { %v1904_v16 = vpop.f32.mrf.mxu0  ;;  %v1909_v0 = vpop.f32.mrf.mxu1  ;;  %v1584_v30 = vadd.f32 %v1583_v25, %v1582_v28 }
 0x3aa   : > { %v1302_v17 = vpop.f32.mrf.mxu1  ;;  %v1345_v18 = vpop.f32.mrf.mxu0 }
 0x3ab   : > { %v1585_v29 = vsel %vm1581_vm4, %v1345_v18, 0.0 }
 0x3ac   : > { %v1910_v19 = vpop.f32.mrf.mxu1  ;;  %v1915_v20 = vpop.f32.mrf.mxu0  ;;  %v1586_v34 = vadd.f32 %v1585_v29, %v1584_v30 }
 0x3ae   : > { %v1348_v21 = vpop.f32.mrf.mxu0  ;;  %v1391_v22 = vpop.f32.mrf.mxu1 }
 0x3af   : > { %v1587_v33 = vsel %vm1581_vm4, %v1391_v22, 0.0 }
 0x3b0   : > { %v1916_v23 = vpop.f32.mrf.mxu0  ;;  %v1921_v24 = vpop.f32.mrf.mxu1  ;;  %v1588_v38 = vadd.f32 %v1587_v33, %v1586_v34 }
 0x3b2   : > { %v1394_v26 = vpop.f32.mrf.mxu1  ;;  %v1437_v27 = vpop.f32.mrf.mxu0 }
 0x3b3   : > { %v1589_v37 = vsel %vm1581_vm4, %v1437_v27, 0.0 }
 0x3b4   : > { %v1922_v31 = vpop.f32.mrf.mxu1  ;;  %v1927_v32 = vpop.f32.mrf.mxu0  ;;  %v1590_v42 = vadd.f32 %v1589_v37, %v1588_v38 }
 0x3b6   : > { %v1440_v35 = vpop.f32.mrf.mxu0  ;;  %v1483_v36 = vpop.f32.mrf.mxu1 }
 0x3b7   : > { %v1591_v41 = vsel %vm1581_vm4, %v1483_v36, 0.0 }
 0x3b8   : > { %v1928_v39 = vpop.f32.mrf.mxu0  ;;  %v1933_v40 = vpop.f32.mrf.mxu1  ;;  %v1592_v46 = vadd.f32 %v1591_v41, %v1590_v42 }
 0x3ba   : > { %v1486_v43 = vpop.f32.mrf.mxu1  ;;  %v1529_v44 = vpop.f32.mrf.mxu0 }
 0x3bb   : > { %v1593_v45 = vsel %vm1581_vm4, %v1529_v44, 0.0 }
 0x3bc   : > { %v1934_v47 = vpop.f32.mrf.mxu1  ;;  %v1939_v48 = vpop.f32.mrf.mxu0  ;;  %v1594_v49 = vadd.f32 %v1593_v45, %v1592_v46 }
 0x3be   : > { %v1532_v50 = vpop.f32.mrf.mxu0  ;;  %v1575_v51 = vpop.f32.mrf.mxu1 }
 0x3bf   : > { %v1595_v52 = vsel %vm1581_vm4, %v1575_v51, 0.0 }
 0x3c0   : > { %v1596_v54 = vadd.f32 %v1595_v52, %v1594_v49  ;;  %v1940_v55 = vpop.f32.mrf.mxu0  ;;  %v1945_v56 = vpop.f32.mrf.mxu1 }
 0x3c2   : > { %v1604_v58 = vadd.f32 %v1747_v53, %v1596_v54  ;;  %v1578_v57 = vpop.f32.mrf.mxu1 }
 0x3c4   : > { %v1946_v60 = vpop.f32.mrf.mxu1  ;;  %1605 = vst.msk [vmem:[%s285_s15] sm:$0xff] %vm1581_vm4, %v1604_v58 }
 0x3c5   : > { %2033 = shalt.err (!%p2030_p3)
}
 0x3c6   : > { %s2034_s9 = scalar_lea.hbm %s2435_s19, 128  ;;  %s2038_s12 = scalar_lea.hbm %s2479_s6, 256 }
 0x3c7   : > { %p2035_p4 = scmp.ne.s32.totalorder %s2435_s19, %s2034_s9  ;;  %p2039_p9 = scmp.lt.s32.totalorder %s2435_s19, %s2479_s6 }
 0x3c8   : > { %p2040_p10 = scmp.lt.s32.totalorder %s2038_s12, %s2034_s9 }
 0x3c9   : > { %p2036_p7 = pnand %p2035_p4, %p2158_p5 }
 0x3ca   : > { %p2041_p11 = por %p2040_p10, %p2039_p9 }
 0x3cb   : > { %p2037_p8 = pneg %p2036_p7 }
 0x3cd   : > { %p2042_p12 = pnand %p2041_p11, %p2037_p8 }
 0x3cf   : > { %2045 = shalt.err (!%p2042_p12)
}
 0x3d0   : > { %1947 = dma.vmem_to_hbm [thread:$0]  (%p2158_p5), %s1621_s16, 128, %s2435_s19, %s1607_s20  }
 0x3d1 PF: > { %p1953_p13 = scmp.ge.s32.totalorder %s2080_s24, 2  ;;  %s1632_s15 = sand.u32 1, %s2068_s21  }
 0x3d2   : > { %s1633_s17 = scalar_lea.sflag [#allocation3], %s1632_s15 }
 0x3d3   : > { %p1950_p0 = pnand %p1953_p13, %p2162_p6 }
 0x3d5   : > { %p1951_p1 = pneg %p1950_p0 }
 0x3d7   : > { %2063 = dma.done.wait (%p1951_p1), %s1633_s17, 128  }
 0x3d8   : > { %2065 = vsyncadd (%p1951_p1), %s1633_s17, 4294967168  ;;  %p16_p2 = scmp.ge.s32.totalorder %s2145_s27, 4   ;;  %s2482_s21 = smov %s2072_s22 }
 0x3d9   : > { %s2483_s22 = smov %s2076_s23  ;;  %s2484_s23 = smov %s2156_s30 }
 0x3da   : > { %s2485_s24 = smov %s2145_s27  ;;  %18 = sbr.rel (!%p16_p2) target bundleno = 3 (0x3), region = 88 }
 0x3df   :  { %1638 = vsyncpa [#allocation3], 1 }
 0x3e0   :  { %1640 = vsyncpa [#allocation3 + $0x1], 1 }

</bundles_post_ra>
